<compile_context>
chip_gen: v7x
topology: tpu7x:2x2x1
jax: 0.10.0
libtpu: 0.0.40
codegen_flags: <defaults>
</compile_context>

<pallas_src>
import functools

import jax
import jax.numpy as jnp
from jax import lax
from jax.experimental import pallas as pl
from jax.experimental.pallas import tpu as pltpu


def _self_attn_kernel(gamma_ref,                 # SMEM (1, 1)
                      x_ref,                     # VMEM (1, C, N)
                      w_ref,                     # VMEM (R, C)  fused [Wq; Wk; Wv] (row-padded)
                      b_ref,                     # VMEM (R, 1)  fused biases
                      out_ref,                   # VMEM (1, C, TQ)
                      attn_ref,                  # VMEM (1, TQ, N)
                      qkv_ref,                   # VMEM scratch (R, N) f32
                      *, C, Cq, Cq_pad, TQ, compute_dtype, approx_softmax):
    qi = pl.program_id(1)

    # Fused q/k/v projection, computed once per batch element and kept resident
    # in VMEM scratch across all query tiles of this batch (q axis is
    # "arbitrary"; x block index is constant in qi so it is not re-fetched).
    @pl.when(qi == 0)
    def _():
        x_full = x_ref[0]                                            # (C, N)
        qkv_ref[...] = (
            jnp.dot(w_ref[...], x_full, preferred_element_type=jnp.float32)
            + b_ref[...])                                            # (R, N)

    col = pl.multiple_of(qi * TQ, TQ)

    q_t = qkv_ref[pl.ds(0, Cq), pl.ds(col, TQ)]                      # (Cq, TQ)
    k = qkv_ref[pl.ds(Cq_pad, Cq), :]                                # (Cq, N)
    v = qkv_ref[pl.ds(2 * Cq_pad, C), :]                             # (C,  N)

    # energy[i, j] = <q_i, k_j>  (contract the channel axis of both operands,
    # no explicit transpose materialized).
    energy = lax.dot_general(
        q_t.astype(compute_dtype), k.astype(compute_dtype),
        dimension_numbers=(((0,), (0,)), ((), ())),
        preferred_element_type=jnp.float32)                          # (TQ, N)

    # Softmax over keys (dim=-1), math in f32.
    m = jnp.max(energy, axis=-1, keepdims=True)
    e = jnp.exp(energy - m)
    s = jnp.sum(e, axis=-1, keepdims=True)
    if approx_softmax:
        attn = e * pl.reciprocal(s, approx=True)                     # EUP path
    else:
        attn = e / s                                                 # (TQ, N)

    attn_ref[0] = attn.astype(attn_ref.dtype)

    # agg[c, i] = sum_j v[c, j] * attn[i, j]  -> (C, TQ): lane-dense output,
    # matches torch.bmm(proj_value, attention.transpose(1, 2)).
    agg = lax.dot_general(
        v.astype(compute_dtype), attn.astype(compute_dtype),
        dimension_numbers=(((1,), (1,)), ((), ())),
        preferred_element_type=jnp.float32)                          # (C, TQ)

    x_tile = x_ref[0, :, pl.ds(col, TQ)]                             # (C, TQ)
    out_ref[0] = (gamma_ref[0, 0] * agg + x_tile).astype(out_ref.dtype)


def _pick_tq(N):
    """Largest query tile (multiple of 128) dividing N with a sane VMEM cap."""
    budget = 24 << 20                 # keep per-tile working set well under VMEM
    for t in (1024, 512, 256, 128):
        if N % t == 0 and 12 * t * N * 4 <= budget:
            return t
    return N                          # small / odd N: single full-row tile


def self_attn_pallas(x_nchw, params, *, tq=None,
                     compute_dtype=jnp.bfloat16,
                     approx_softmax=True,
                     attn_dtype=jnp.float32):
    """x_nchw: (B, C, H, W) float32. Returns (out (B,C,H,W), attention (B,N,N))."""
    B, C, H, W = x_nchw.shape
    assert C % 8 == 0 and C >= 8, "in_dim must be a multiple of 8 and >= 8"
    N = H * W
    Cq = C // 8

    TQ = tq if tq is not None else _pick_tq(N)
    assert N % TQ == 0 and (TQ % 128 == 0 or TQ == N), "bad query tile size"
    n_qt = N // TQ

    # NCHW -> (B, C, N): a free reshape (no transpose).
    x_bcn = x_nchw.reshape(B, C, N)

    # Fused projection weight, row groups padded to sublane multiples of 8 so
    # the in-kernel slices are aligned.  Conv2d(k=1) weight layout: (out, in).
    Cq_pad = ((Cq + 7) // 8) * 8
    R = 2 * Cq_pad + C
    w_all = jnp.zeros((R, C), jnp.float32)
    w_all = w_all.at[0:Cq].set(params["wq"])
    w_all = w_all.at[Cq_pad:Cq_pad + Cq].set(params["wk"])
    w_all = w_all.at[2 * Cq_pad:2 * Cq_pad + C].set(params["wv"])
    b_all = jnp.zeros((R,), jnp.float32)
    b_all = b_all.at[0:Cq].set(params["bq"])
    b_all = b_all.at[Cq_pad:Cq_pad + Cq].set(params["bk"])
    b_all = b_all.at[2 * Cq_pad:2 * Cq_pad + C].set(params["bv"])
    b_all = b_all.reshape(R, 1)

    gamma = params["gamma"].reshape(1, 1).astype(jnp.float32)

    # Explicit scoped-VMEM budget from the chosen block sizes (double-buffered
    # inputs/outputs + scratch + per-tile temporaries) with headroom.
    f32b = 4
    vmem_bytes = (
        2 * C * N * f32b              # x block
        + 2 * (R * C + R) * f32b      # fused weight + bias
        + 2 * C * TQ * f32b           # out block
        + 2 * TQ * N * f32b           # attn block
        + R * N * f32b                # qkv scratch
        + 8 * TQ * N * f32b)          # energy / exp / attn temporaries (+ bf16 copies)
    vmem_limit = min(int(vmem_bytes * 1.5) + (2 << 20), 64 << 20)

    kernel = functools.partial(
        _self_attn_kernel, C=C, Cq=Cq, Cq_pad=Cq_pad, TQ=TQ,
        compute_dtype=compute_dtype, approx_softmax=approx_softmax)

    out_bcn, attn = pl.pallas_call(
        kernel,
        out_shape=(
            jax.ShapeDtypeStruct((B, C, N), x_nchw.dtype),
            jax.ShapeDtypeStruct((B, N, N), attn_dtype),
        ),
        grid_spec=pltpu.PrefetchScalarGridSpec(
            num_scalar_prefetch=0,
            grid=(B, n_qt),
            in_specs=[
                pl.BlockSpec(memory_space=pltpu.SMEM),                     # gamma
                pl.BlockSpec((1, C, N), lambda b, q: (b, 0, 0)),           # x (full row range)
                pl.BlockSpec((R, C), lambda b, q: (0, 0)),                 # fused W
                pl.BlockSpec((R, 1), lambda b, q: (0, 0)),                 # fused b
            ],
            out_specs=[
                pl.BlockSpec((1, C, TQ), lambda b, q: (b, 0, q)),          # out (lane-dense)
                pl.BlockSpec((1, TQ, N), lambda b, q: (b, q, 0)),          # attention tile
            ],
            scratch_shapes=[pltpu.VMEM((R, N), jnp.float32)],              # fused q/k/v
        ),
        compiler_params=pltpu.CompilerParams(
            dimension_semantics=("parallel", "arbitrary"),
            vmem_limit_bytes=vmem_limit),
    )(gamma, x_bcn, w_all, b_all)

    # (B, C, N) -> NCHW: free reshape, no transpose needed.
    out_nchw = out_bcn.reshape(B, C, H, W)
    return out_nchw, attn
    # TODO(synk): for very large N, add a flash-style inner key-tile loop with
    # online softmax so k/v and the attn tile need not span the full row range.


def _reference(x_nchw, params):
    """Plain-JAX reference mirroring the PyTorch forward exactly (f32)."""
    B, C, H, W = x_nchw.shape
    N = H * W
    hp = lax.Precision.HIGHEST
    x = x_nchw.reshape(B, C, N)
    q = jnp.einsum("oc,bcn->bon", params["wq"], x, precision=hp) + params["bq"][None, :, None]
    k = jnp.einsum("oc,bcn->bon", params["wk"], x, precision=hp) + params["bk"][None, :, None]
    v = jnp.einsum("oc,bcn->bon", params["wv"], x, precision=hp) + params["bv"][None, :, None]
    energy = jnp.einsum("bci,bcj->bij", q, k, precision=hp)        # (B, N, N)
    attn = jax.nn.softmax(energy, axis=-1)
    out = jnp.einsum("bcj,bij->bci", v, attn, precision=hp)        # (B, C, N)
    out = params["gamma"][0] * out + x
    return out.reshape(B, C, H, W), attn


def make_params(key, C):
    """Conv2d(k=1) weights in native (out_channels, in_channels) layout."""
    Cq = C // 8
    ks = jax.random.split(key, 6)
    return {
        "wq": 0.1 * jax.random.normal(ks[0], (Cq, C), jnp.float32),
        "bq": 0.1 * jax.random.normal(ks[1], (Cq,), jnp.float32),
        "wk": 0.1 * jax.random.normal(ks[2], (Cq, C), jnp.float32),
        "bk": 0.1 * jax.random.normal(ks[3], (Cq,), jnp.float32),
        "wv": 0.1 * jax.random.normal(ks[4], (C, C), jnp.float32),
        "bv": 0.1 * jax.random.normal(ks[5], (C,), jnp.float32),
        # nn.Parameter(torch.zeros(1)) — deterministic init value.
        "gamma": jnp.zeros((1,), jnp.float32),
    }


if __name__ == "__main__":
    key = jax.random.PRNGKey(0)
    kx, kp = jax.random.split(key)

    B, C, H, W = 2, 32, 16, 16            # in_dim=32 -> Cq=4, N=256
    N = H * W
    x = jax.random.normal(kx, (B, C, H, W), jnp.float32)
    params = make_params(kp, C)           # gamma = 0, as in the PyTorch init

    # --- exact-math configuration (f32 MXU inputs, exact softmax divide,
    #     TQ=128 so the multi-tile / scratch-reuse path is exercised), with a
    #     non-zero gamma so the attention + residual path is fully verified.
    params_g = dict(params, gamma=jnp.full((1,), 0.7, jnp.float32))
    run_exact = jax.jit(functools.partial(
        self_attn_pallas, tq=128, compute_dtype=jnp.float32, approx_softmax=False))
    out_e, attn_e = run_exact(x, params_g)
    jax.block_until_ready((out_e, attn_e))
    out_r, attn_r = _reference(x, params_g)
    assert out_e.shape == (B, C, H, W) and attn_e.shape == (B, N, N)
    assert jnp.allclose(out_e, out_r, rtol=1e-4, atol=1e-4)
    assert jnp.allclose(attn_e, attn_r, rtol=1e-4, atol=1e-5)

    # --- fast configuration (default: bf16 MXU inputs + f32 accumulation,
    #     EUP approx-reciprocal softmax, auto tile) vs the f32 reference.
    out_f, attn_f = jax.jit(self_attn_pallas)(x, params)
    jax.block_until_ready((out_f, attn_f))
    out_r0, attn_r0 = _reference(x, params)
    assert out_f.shape == (B, C, H, W) and attn_f.shape == (B, N, N)
    assert jnp.allclose(out_f, out_r0, rtol=1e-4, atol=1e-4)   # gamma=0 -> residual
    assert jnp.allclose(attn_f, attn_r0, rtol=5e-2, atol=5e-4)
    assert float(jnp.max(jnp.abs(attn_f.sum(axis=-1) - 1.0))) < 1e-2

    print("KERNEL_OK")
</pallas_src>

<mosaic_0001>
module attributes {stable_mosaic.version = 11 : i64} {
  func.func @_self_attn_kernel(%arg0: i32, %arg1: i32, %arg2: memref<1x1xf32, #tpu.memory_space<smem>>, %arg3: memref<1x32x256xf32, #tpu.memory_space<vmem>>, %arg4: memref<48x32xf32, #tpu.memory_space<vmem>>, %arg5: memref<48x1xf32, #tpu.memory_space<vmem>>, %arg6: memref<1x32x128xf32, #tpu.memory_space<vmem>>, %arg7: memref<1x128x256xf32, #tpu.memory_space<vmem>>, %arg8: memref<48x256xf32, #tpu.memory_space<vmem>>) attributes {dimension_semantics = [#tpu.dimension_semantics<parallel>, #tpu.dimension_semantics<arbitrary>], iteration_bounds = array<i64: 2, 2>, scalar_prefetch = 0 : i64, scratch_operands = 1 : i64, tpu.core_type = #tpu.core_type<tc>, window_params = [{transform_indices = @transform_0, window_bounds = array<i64: 1, 1>}, {transform_indices = @transform_1, window_bounds = array<i64: 1, 32, 256>}, {pipeline_mode = #tpu.pipeline_mode<synchronous>, transform_indices = @transform_2, window_bounds = array<i64: 48, 32>}, {pipeline_mode = #tpu.pipeline_mode<synchronous>, transform_indices = @transform_3, window_bounds = array<i64: 48, 1>}, {transform_indices = @transform_4, window_bounds = array<i64: 1, 32, 128>}, {transform_indices = @transform_5, window_bounds = array<i64: 1, 128, 256>}]} {
    %c0_i32 = arith.constant 0 : i32
    %0 = arith.cmpi eq, %arg1, %c0_i32 : i32
    %1 = arith.extui %0 : i1 to i32
    %c0_i32_0 = arith.constant 0 : i32
    %2 = arith.cmpi ne, %1, %c0_i32_0 : i32
    scf.if %2 {
      %c0_16 = arith.constant 0 : index
      %c0_17 = arith.constant 0 : index
      %c0_18 = arith.constant 0 : index
      %33 = vector.load %arg3[%c0_16, %c0_17, %c0_18] : memref<1x32x256xf32, #tpu.memory_space<vmem>>, vector<1x32x256xf32>
      %34 = vector.shape_cast %33 : vector<1x32x256xf32> to vector<32x256xf32>
      %c0_19 = arith.constant 0 : index
      %c0_20 = arith.constant 0 : index
      %35 = vector.load %arg4[%c0_19, %c0_20] : memref<48x32xf32, #tpu.memory_space<vmem>>, vector<48x32xf32>
      %cst_21 = arith.constant dense<0.000000e+00> : vector<48x256xf32>
      %36 = tpu.matmul %35, %34, %cst_21 {dimension_numbers = #tpu.dot_dimension_numbers<[1], [0], [0], [1], [0, 0, 1, 1], [], []>} : vector<48x32xf32>, vector<32x256xf32>, vector<48x256xf32> -> vector<48x256xf32>
      %c0_22 = arith.constant 0 : index
      %c0_23 = arith.constant 0 : index
      %37 = vector.load %arg5[%c0_22, %c0_23] : memref<48x1xf32, #tpu.memory_space<vmem>>, vector<48x1xf32>
      %38 = vector.broadcast %37 : vector<48x1xf32> to vector<48x256xf32>
      %39 = arith.addf %36, %38 : vector<48x256xf32>
      %c0_24 = arith.constant 0 : index
      %c0_25 = arith.constant 0 : index
      %40 = vector.load %arg8[%c0_24, %c0_25] : memref<48x256xf32, #tpu.memory_space<vmem>>, vector<48x256xf32>
      tpu.vector_store %arg8[%c0_24, %c0_25], %39 {strides = array<i32>} : memref<48x256xf32, #tpu.memory_space<vmem>>, vector<48x256xf32>,
    } else {
    }
    %c128_i32 = arith.constant 128 : i32
    %3 = arith.muli %arg1, %c128_i32 : i32
    %4 = tpu.assume_multiple %3, 128 : i32
    %c0 = arith.constant 0 : index
    %5 = arith.index_cast %4 : i32 to index
    %6 = vector.load %arg8[%c0, %5] : memref<48x256xf32, #tpu.memory_space<vmem>>, vector<4x128xf32>
    %c8 = arith.constant 8 : index
    %c0_1 = arith.constant 0 : index
    %7 = vector.load %arg8[%c8, %c0_1] : memref<48x256xf32, #tpu.memory_space<vmem>>, vector<4x256xf32>
    %c16 = arith.constant 16 : index
    %c0_2 = arith.constant 0 : index
    %8 = vector.load %arg8[%c16, %c0_2] : memref<48x256xf32, #tpu.memory_space<vmem>>, vector<32x256xf32>
    %cst = arith.constant dense<0.000000e+00> : vector<128x256xf32>
    %9 = tpu.matmul %6, %7, %cst {dimension_numbers = #tpu.dot_dimension_numbers<[0], [0], [1], [1], [0, 1, 1, 1], [], []>} : vector<4x128xf32>, vector<4x256xf32>, vector<128x256xf32> -> vector<128x256xf32>
    %cst_3 = arith.constant dense<0xFF800000> : vector<128xf32>
    %10 = vector.multi_reduction <maximumf>, %9, %cst_3 [1] : vector<128x256xf32> to vector<128xf32>
    %11 = vector.shape_cast %10 : vector<128xf32> to vector<128x1xf32>
    %12 = vector.broadcast %11 : vector<128x1xf32> to vector<128x256xf32>
    %13 = arith.subf %9, %12 : vector<128x256xf32>
    %14 = math.exp %13 : vector<128x256xf32>
    %cst_4 = arith.constant dense<0.000000e+00> : vector<128xf32>
    %15 = vector.multi_reduction <add>, %14, %cst_4 [1] : vector<128x256xf32> to vector<128xf32>
    %16 = vector.shape_cast %15 : vector<128xf32> to vector<128x1xf32>
    %17 = vector.broadcast %16 : vector<128x1xf32> to vector<128x256xf32>
    %18 = arith.divf %14, %17 : vector<128x256xf32>
    %c0_5 = arith.constant 0 : index
    %c0_6 = arith.constant 0 : index
    %c0_7 = arith.constant 0 : index
    %19 = vector.load %arg7[%c0_5, %c0_6, %c0_7] : memref<1x128x256xf32, #tpu.memory_space<vmem>>, vector<1x128x256xf32>
    %20 = vector.shape_cast %19 : vector<1x128x256xf32> to vector<128x256xf32>
    %21 = vector.shape_cast %18 : vector<128x256xf32> to vector<1x128x256xf32>
    tpu.vector_store %arg7[%c0_5, %c0_6, %c0_7], %21 {strides = array<i32>} : memref<1x128x256xf32, #tpu.memory_space<vmem>>, vector<1x128x256xf32>,
    %cst_8 = arith.constant dense<0.000000e+00> : vector<32x128xf32>
    %22 = tpu.matmul %8, %18, %cst_8 {dimension_numbers = #tpu.dot_dimension_numbers<[1], [1], [0], [0], [0, 0, 1, 0], [], []>} : vector<32x256xf32>, vector<128x256xf32>, vector<32x128xf32> -> vector<32x128xf32>
    %c0_9 = arith.constant 0 : index
    %c0_10 = arith.constant 0 : index
    %23 = arith.index_cast %4 : i32 to index
    %24 = vector.load %arg3[%c0_9, %c0_10, %23] : memref<1x32x256xf32, #tpu.memory_space<vmem>>, vector<1x32x128xf32>
    %25 = vector.shape_cast %24 : vector<1x32x128xf32> to vector<32x128xf32>
    %c0_11 = arith.constant 0 : index
    %c0_12 = arith.constant 0 : index
    %26 = memref.load %arg2[%c0_11, %c0_12] : memref<1x1xf32, #tpu.memory_space<smem>>
    %27 = vector.broadcast %26 : f32 to vector<32x128xf32>
    %28 = arith.mulf %27, %22 : vector<32x128xf32>
    %29 = arith.addf %28, %25 : vector<32x128xf32>
    %c0_13 = arith.constant 0 : index
    %c0_14 = arith.constant 0 : index
    %c0_15 = arith.constant 0 : index
    %30 = vector.load %arg6[%c0_13, %c0_14, %c0_15] : memref<1x32x128xf32, #tpu.memory_space<vmem>>, vector<1x32x128xf32>
    %31 = vector.shape_cast %30 : vector<1x32x128xf32> to vector<32x128xf32>
    %32 = vector.shape_cast %29 : vector<32x128xf32> to vector<1x32x128xf32>
    tpu.vector_store %arg6[%c0_13, %c0_14, %c0_15], %32 {strides = array<i32>} : memref<1x32x128xf32, #tpu.memory_space<vmem>>, vector<1x32x128xf32>,
    return
  }
  func.func @transform_0(%arg0: i32, %arg1: i32) -> (i32, i32) {
    %c0_i32 = arith.constant 0 : i32
    %c0_i32_0 = arith.constant 0 : i32
    %c0_i32_1 = arith.constant 0 : i32
    return %c0_i32, %c0_i32_0 : i32, i32
  }
  func.func @transform_1(%arg0: i32, %arg1: i32) -> (i32, i32, i32) {
    %c0_i32 = arith.constant 0 : i32
    %c0_i32_0 = arith.constant 0 : i32
    %c0_i32_1 = arith.constant 0 : i32
    return %arg0, %c0_i32, %c0_i32_0 : i32, i32, i32
  }
  func.func @transform_2(%arg0: i32, %arg1: i32) -> (i32, i32) {
    %c0_i32 = arith.constant 0 : i32
    %c0_i32_0 = arith.constant 0 : i32
    %c0_i32_1 = arith.constant 0 : i32
    return %c0_i32, %c0_i32_0 : i32, i32
  }
  func.func @transform_3(%arg0: i32, %arg1: i32) -> (i32, i32) {
    %c0_i32 = arith.constant 0 : i32
    %c0_i32_0 = arith.constant 0 : i32
    %c0_i32_1 = arith.constant 0 : i32
    return %c0_i32, %c0_i32_0 : i32, i32
  }
  func.func @transform_4(%arg0: i32, %arg1: i32) -> (i32, i32, i32) {
    %c0_i32 = arith.constant 0 : i32
    %c0_i32_0 = arith.constant 0 : i32
    return %arg0, %c0_i32, %arg1 : i32, i32, i32
  }
  func.func @transform_5(%arg0: i32, %arg1: i32) -> (i32, i32, i32) {
    %c0_i32 = arith.constant 0 : i32
    %c0_i32_0 = arith.constant 0 : i32
    return %arg0, %arg1, %c0_i32 : i32, i32, i32
  }
}

</mosaic_0001>

<bundles_post_ra>
// kernel: self_attn_pallas.1
= control target key start
LH: loop header
LB: loop body
LE: loop exit
PB: predicated region body
PF: predicated region fallthrough
CT: control target
= control target key end

     0   :  { %s2204_s0 = inlined_call_operand.<no memory space> [shape: f32[1,1], index: 0, kind: input, shape index: {}]   ;;  %s2205_s1 = inlined_call_operand.vmem [shape: f32[2,32,256], index: 1, kind: input, shape index: {}]   ;;  %s2206_s2 = inlined_call_operand.vmem [shape: f32[48,32], index: 2, kind: input, shape index: {}]   ;;  %s2207_s3 = inlined_call_operand.vmem [shape: f32[48,1], index: 3, kind: input, shape index: {}]   ;;  %s2208_s4 = inlined_call_operand.vmem [shape: f32[2,32,256], index: 4, kind: output, shape index: {0}]   ;;  %s2209_s5 = inlined_call_operand.hbm [shape: f32[2,256,256], index: 5, kind: output, shape index: {1}]  }
   0x1   :  { %11 = sst [smem:[#allocation3]] %s2204_s0 }
   0x2   :  { %12 = vsyncpa [#allocation6], 0 }
   0x3   :  { %14 = vsyncpa [#allocation6 + $0x1], 0  ;;  %s1676_s20 = smov 0   ;;  %s1678_s21 = smov 0  }
   0x4   :  { %s1680_s22 = smov 0   ;;  %s1682_s23 = smov 0  }
   0x5   :  { %s1684_s24 = smov 0   ;;  %s1686_s25 = smov 0  }
   0x6   :  { %s1688_s26 = smov 0   ;;  %s1690_s27 = smov 0  }
   0x7 LB: > { %s1258_s0 = sadd.s32 4294967295, %s1635_s27   ;;  %s1259_s28 = sadd.s32 4294967294, %s1635_s27   ;;  %s1635_s27 = sphi %s1690_s27, %s20_s27   ;;  %s1631_s26 = sphi %s1688_s26, %s2219_s26   ;;  %s1627_s25 = sphi %s1686_s25, %s2218_s25   ;;  %s1623_s24 = sphi %s1684_s24, %s2217_s24   ;;  %s1619_s23 = sphi %s1682_s23, %s2216_s23   ;;  %s1615_s22 = sphi %s1680_s22, %s2215_s22   ;;  %s1611_s21 = sphi %s1678_s21, %s2214_s21   ;;  %s1607_s20 = sphi %s1676_s20, %s2213_s20  }
   0x8   : > { %s29_s29 = sadd.s32 1, %s1627_s25  ;;  %s32_s30 = sadd.s32 1, %s1631_s26 }
   0x9   : > { %p30_p0 = scmp.ge.s32.totalorder %s29_s29, 2  ;;  %p140_p1 = scmp.ne.s32.totalorder %s1615_s22, %s1611_s21 }
   0xa   : > { %p141_p2 = scmp.eq.s32.totalorder %s1258_s0, 3  ;;  %p174_p5 = scmp.ne.s32.totalorder %s1611_s21, %s1607_s20 }
   0xb   : > { %s2221_s29 = smov (%p30_p0, %s29_s29), 0  ;;  %s2223_s30 = smov (!%p30_p0, %s32_s30), %s1631_s26 }
   0xc   : > { %s126_s6 = ssub.s32 %s1627_s25, %s2221_s29  ;;  %p1727_p3 = por %p141_p2, %p140_p1 }
   0xd   : > { %p34_p4 = scmp.ge.s32.totalorder %s2223_s30, 2  ;;  %p175_p6 = scmp.eq.s32.totalorder %s1259_s28, 3 }
   0xe   : > { %p1262_p7 = scmp.ge.s32.totalorder %s1635_s27, 1  ;;  %p210_p9 = scmp.lt.s32.totalorder %s1635_s27, 5 }
   0xf   : > { %s2225_s30 = smov (%p34_p4, %s2223_s30), 0  ;;  %p1736_p8 = por %p175_p6, %p174_p5 }
  0x10   : > { %s125_s9 = ssub.s32 %s1631_s26, %s2225_s30  ;;  %s130_s10 = sadd.s32 1, %s1615_s22 }
  0x11   : > { %s127_s11 = sor.u32 %s126_s6, %s125_s9  ;;  %p211_p10 = pnand %p1262_p7, %p210_p9 }
  0x12   : > { %p128_p11 = scmp.eq.s32.totalorder %s127_s11, 0  ;;  %s1748_s13 = sand.u32 (!%p211_p10), 1, %s1611_s21  }
  0x13   : > { %214 = sbr.rel (%p211_p10) target bundleno = 1262 (0x4ee), region = 36  ;;  %p242_p12 = scmp.lt.s32.totalorder (!%p211_p10), %s1623_s24, 1 }
  0x14   : > { %s1745_s12 = scalar_select %p128_p11, %s1615_s22, %s130_s10  }
  0x15   : > { %s1263_s14 = sshll.u32 (!%p211_p10), %s1748_s13, 5  ;;  %s1264_s15 = sshll.u32 (!%p211_p10), %s1748_s13, 8 }
  0x16   : > { %s1759_s28 = scalar_lea.vmem (!%p211_p10), [#allocation4], %s1263_s14  ;;  %s1761_s6 = scalar_lea.vmem (!%p211_p10), [#allocation5], %s1264_s15 }
  0x17   : > { %p1267_p13 = scmp.ne.s32.totalorder (!%p211_p10), %s1619_s23, 0 }
  0x1a   : > { %s243_s16 = scalar_select %p242_p12, %s1623_s24, 1 }
  0x1b   : > { %251 = sbr.rel (%p1267_p13) target bundleno = 265 (0x109), region = 40  ;;  %v1637_v7 = vmov (!%p1267_p13), 0.0   ;;  %v1638_v12 = vmov (!%p1267_p13), 0   ;;  %v268_v14 = vld [vmem:[%s2207_s3 + $0x10] sm:$0xff] (!%p1267_p13)  ;;  %v266_v15 = vld [vmem:[%s2207_s3] sm:$0xff] (!%p1267_p13)  ;;  %v269_v16 = vld [vmem:[%s2207_s3 + $0x18] sm:$0xff] (!%p1267_p13) }
  0x1c   : > { %s1305_s17 = sshll.u32 %s243_s16, 6  ;;  %385 = vmatprep.mubr.f32.mxu0 (!%p1267_p13), %v1637_v7  ;;  %403 = vmatprep.mubr.f32.mxu1 (!%p1267_p13), %v1637_v7  ;;  %v267_v17 = vld [vmem:[%s2207_s3 + $0x8] sm:$0xff] (!%p1267_p13)  ;;  %v260_v18 = vld [vmem:[%s2206_s2] sm:$0xff] (!%p1267_p13)  ;;  %vm302_vm0 = vcmask (!%p1267_p13), 261120   ;;  %v263_v19 = vld [vmem:[%s2206_s2 + $0x18] sm:$0xff] (!%p1267_p13) }
  0x1d   : > { %s1757_s0 = scalar_lea.vmem %s2205_s1, %s1305_s17  ;;  %1444 = vset.pattern.permute.xlu1 (!%p1267_p13), %v1638_v12  ;;  %1443 = vset.pattern.permute.xlu0 (!%p1267_p13), %v1638_v12  ;;  %v271_v20 = vld [vmem:[%s2207_s3 + $0x28] sm:$0xff] (!%p1267_p13)  ;;  %v270_v21 = vld [vmem:[%s2207_s3 + $0x20] sm:$0xff] (!%p1267_p13)  ;;  %v262_v24 = vld [vmem:[%s2206_s2 + $0x10] sm:$0xff] (!%p1267_p13) }
  0x1e   : > { %v253_v0 = vld [vmem:[%s1757_s0 + $0x8] sm:$0xff] (!%p1267_p13)  ;;  %v255_v1 = vld [vmem:[%s1757_s0 + $0x18] sm:$0xff] (!%p1267_p13)  ;;  %v252_v2 = vld [vmem:[%s1757_s0] sm:$0xff] (!%p1267_p13)  ;;  %284 = vperm.xlu1 (!%p1267_p13), %1444, %v268_v14   ;;  %274 = vperm.xlu0 (!%p1267_p13), %1443, %v266_v15  }
  0x1f   : > { %v1307_v3 = vpack.c.bf16 (!%p1267_p13), %v255_v1, %v253_v0  ;;  %v254_v4 = vld [vmem:[%s1757_s0 + $0x10] sm:$0xff] (!%p1267_p13)  ;;  %v257_v5 = vld [vmem:[%s1757_s0 + $0x28] sm:$0xff] (!%p1267_p13)  ;;  %v259_v6 = vld [vmem:[%s1757_s0 + $0x38] sm:$0xff] (!%p1267_p13) }
  0x20   : > { %v1309_v8 = vpack.c.bf16 (!%p1267_p13), %v254_v4, %v252_v2  ;;  %v1311_v9 = vpack.c.bf16 (!%p1267_p13), %v259_v6, %v257_v5  ;;  %v256_v10 = vld [vmem:[%s1757_s0 + $0x20] sm:$0xff] (!%p1267_p13)  ;;  %v258_v11 = vld [vmem:[%s1757_s0 + $0x30] sm:$0xff] (!%p1267_p13)  ;;  %v261_v22 = vld [vmem:[%s2206_s2 + $0x8] sm:$0xff] (!%p1267_p13) }
  0x21   : > { %1308 = vmatprep.subr.bf16.mxu0 (!%p1267_p13), %v1307_v3  ;;  %1347 = vmatprep.subr.bf16.mxu1 (!%p1267_p13), %v1307_v3  ;;  %v1313_v13 = vpack.c.bf16 (!%p1267_p13), %v258_v11, %v256_v10  ;;  %v264_v23 = vld [vmem:[%s2206_s2 + $0x20] sm:$0xff] (!%p1267_p13)  ;;  %v265_v25 = vld [vmem:[%s2206_s2 + $0x28] sm:$0xff] (!%p1267_p13) }
  0x22   : > { %1310 = vmatpush1.bf16.msra.mxu0 %v1309_v8  ;;  %1349 = vmatpush1.bf16.msra.mxu1 %v1309_v8 }
  0x23   : > { %1312 = vmatprep.subr.bf16.mxu0 %v1311_v9  ;;  %1348 = vmatprep.subr.bf16.mxu1 %v1311_v9 }
  0x24   : > { %289 = vperm.xlu1 %1444, %v269_v16   ;;  %279 = vperm.xlu0 %1443, %v267_v17  }
  0x26   : > { %1314 = vmatpush1.bf16.msra.mxu0 %v1313_v13  ;;  %1350 = vmatpush1.bf16.msra.mxu1 %v1313_v13 }
  0x28   : > { %299 = vperm.xlu1 %1444, %v271_v20   ;;  %294 = vperm.xlu0 %1443, %v270_v21  }
  0x29   : > { %1268 = vmatmul.mubr.msk.f32.vlgmr.msra.gmra.mrb[0].mxu0 %vm302_vm0, %v260_v18  ;;  %1271 = vmatmul.mubr.msk.f32.vlgmr.msra.gmra.mrb[0].mxu1 %vm302_vm0, %v263_v19 }
  0x2a   : > { %391 = vmatprep.mubr.f32.mxu0 %v1637_v7  ;;  %409 = vmatprep.mubr.f32.mxu1 %v1637_v7 }
  0x2d   : > { %1269 = vmatmul.mubr.msk.f32.gmra.mrb[2].mxu0 %vm302_vm0, %v261_v22  ;;  %1272 = vmatmul.mubr.msk.f32.gmra.mrb[2].mxu1 %vm302_vm0, %v264_v23 }
  0x2e   : > { %397 = vmatprep.mubr.f32.mxu0 %v1637_v7  ;;  %415 = vmatprep.mubr.f32.mxu1 %v1637_v7 }
  0x31   : > { %1270 = vmatmul.mubr.msk.f32.gmra.mrb[4].mxu0 %vm302_vm0, %v262_v24  ;;  %1273 = vmatmul.mubr.msk.f32.gmra.mrb[4].mxu1 %vm302_vm0, %v265_v25 }
  0x9d   : > { %v275_v26 = vpop.permute.xlu0 %274  ;;  %v285_v27 = vpop.permute.xlu1 %284 }
  0xa3   : > { %v280_v28 = vpop.permute.xlu0 %279  ;;  %v290_v29 = vpop.permute.xlu1 %289 }
  0xa7   : > { %v295_v38 = vpop.permute.xlu0 %294  ;;  %v300_v47 = vpop.permute.xlu1 %299 }
  0xfc   : > { %v387_v30 = vpop.f32.mrb[0].mxu0  ;;  %v405_v31 = vpop.f32.mrb[0].mxu1 }
  0xfd   : > { %v388_v32 = vadd.f32 %v387_v30, %v275_v26  ;;  %v406_v33 = vadd.f32 %v405_v31, %v290_v29  ;;  %v389_v34 = vpop.f32.mrb[1].mxu0  ;;  %v407_v35 = vpop.f32.mrb[1].mxu1 }
  0xfe   : > { %v390_v36 = vadd.f32 %v389_v34, %v275_v26  ;;  %v408_v37 = vadd.f32 %v407_v35, %v290_v29 }
  0xff   : > { %422 = vst [vmem:[#allocation2] sm:$0xff] %v388_v32  ;;  %428 = vst [vmem:[#allocation2 + $0x30] sm:$0xff] %v406_v33 }
 0x100   : > { %423 = vst [vmem:[#allocation2 + $0x8] sm:$0xff] %v390_v36  ;;  %429 = vst [vmem:[#allocation2 + $0x38] sm:$0xff] %v408_v37  ;;  %v393_v39 = vpop.f32.mrb[2].mxu0  ;;  %v411_v40 = vpop.f32.mrb[2].mxu1 }
 0x101   : > { %v394_v41 = vadd.f32 %v393_v39, %v280_v28  ;;  %v412_v42 = vadd.f32 %v411_v40, %v295_v38  ;;  %v395_v43 = vpop.f32.mrb[3].mxu0  ;;  %v413_v44 = vpop.f32.mrb[3].mxu1 }
 0x102   : > { %v396_v45 = vadd.f32 %v395_v43, %v280_v28  ;;  %v414_v46 = vadd.f32 %v413_v44, %v295_v38 }
 0x103   : > { %424 = vst [vmem:[#allocation2 + $0x10] sm:$0xff] %v394_v41  ;;  %430 = vst [vmem:[#allocation2 + $0x40] sm:$0xff] %v412_v42 }
 0x104   : > { %425 = vst [vmem:[#allocation2 + $0x18] sm:$0xff] %v396_v45  ;;  %431 = vst [vmem:[#allocation2 + $0x48] sm:$0xff] %v414_v46  ;;  %v399_v48 = vpop.f32.mrb[4].mxu0  ;;  %v417_v49 = vpop.f32.mrb[4].mxu1 }
 0x105   : > { %v400_v50 = vadd.f32 %v399_v48, %v285_v27  ;;  %v418_v51 = vadd.f32 %v417_v49, %v300_v47  ;;  %v401_v52 = vpop.f32.mrb[5].mxu0  ;;  %v419_v53 = vpop.f32.mrb[5].mxu1 }
 0x106   : > { %v402_v54 = vadd.f32 %v401_v52, %v285_v27  ;;  %v420_v55 = vadd.f32 %v419_v53, %v300_v47 }
 0x107   : > { %426 = vst [vmem:[#allocation2 + $0x20] sm:$0xff] %v400_v50  ;;  %432 = vst [vmem:[#allocation2 + $0x50] sm:$0xff] %v418_v51 }
 0x108   : > { %427 = vst [vmem:[#allocation2 + $0x28] sm:$0xff] %v402_v54  ;;  %433 = vst [vmem:[#allocation2 + $0x58] sm:$0xff] %v420_v55 }
 0x109 PF: > { %s1274_s17 = sshll.u32 %s1619_s23, 7  ;;  %vm531_vm1 = vcmask 1043456   ;;  %v1639_v58 = vmov 0.0   ;;  %vm482_vm2 = vcmask 31744   ;;  %s1062_s10 = sld [smem:[#allocation3]] }
 0x10a   : > { %v440_v57 = vld [vmem:[#allocation2 + $0x10] sm:$0xf]  ;;  %s1815_s18 = sshra.s32 %s1274_s17, 7  ;;  %602 = vmatprep.mubr.f32.mxu0 %v1639_v58  ;;  %s1297_s14 = sshll.u32 (%p1727_p3), %s1623_s24, 3 }
 0x10b   : > { %v441_v56 = vld [vmem:[#allocation2 + $0x18] sm:$0xf]  ;;  %s1275_s19 = sshll.u32 %s1815_s18, 3  ;;  %s1089_s15 = sadd.s32 (%p1727_p3), %s1619_s23, %s1297_s14 }
 0x10c   : > { %1276 = vmatprep.subr.msk.mxu0 %vm531_vm1, %v441_v56  ;;  %s438_s9 = scalar_lea.vmem [#allocation2], %s1275_s19  ;;  %s1057_s11 = scalar_lea.vmem %s1757_s0, %s1275_s19 }
 0x10d   : > { %1277 = vmatpush1.msk.msra.mxu0 %vm531_vm1, %v440_v57  ;;  %s1298_s16 = sshll.u32 (%p1727_p3), %s1089_s15, 3 }
 0x10e   : > { %s1091_s19 = scalar_lea.vmem (%p1727_p3), %s2208_s4, %s1298_s16 }
 0x10f   : > { %v439_v59 = vld [vmem:[%s438_s9] sm:$0xf] }
 0x110   : > { %450 = vxpose.xlu0.b32.start.end [1/1] (short) %v439_v59, 128 }
 0x190   : > { %v466_v60 = vpop.trf.xlu0 }
 0x191   : > { %1278 = vmatmul.mubr.msk.f32.vlgmr.msra.gmra.mrb[0].mxu0 %vm482_vm2, %v466_v60 }
 0x192   : > { %608 = vmatprep.mubr.f32.mxu0 %v1639_v58 }
 0x194   : > { %v467_v61 = vpop.trf.xlu0 }
 0x195   : > { %1279 = vmatmul.mubr.msk.f32.gmra.mrb[2].mxu0 %vm482_vm2, %v467_v61 }
 0x196   : > { %614 = vmatprep.mubr.f32.mxu0 %v1639_v58 }
 0x198   : > { %v468_v62 = vpop.trf.xlu0 }
 0x199   : > { %1280 = vmatmul.mubr.msk.f32.gmra.mrb[4].mxu0 %vm482_vm2, %v468_v62 }
 0x19a   : > { %620 = vmatprep.mubr.f32.mxu0 %v1639_v58 }
 0x19c   : > { %v469_v63 = vpop.trf.xlu0 }
 0x19d   : > { %1281 = vmatmul.mubr.msk.f32.gmra.mrb[6].mxu0 %vm482_vm2, %v469_v63 }
 0x19e   : > { %626 = vmatprep.mubr.f32.mxu0 %v1639_v58 }
 0x1a0   : > { %v470_v0 = vpop.trf.xlu0 }
 0x1a1   : > { %1282 = vmatmul.mubr.msk.f32.gmra.mrb[8].mxu0 %vm482_vm2, %v470_v0 }
 0x1a2   : > { %632 = vmatprep.mubr.f32.mxu0 %v1639_v58 }
 0x1a4   : > { %v471_v1 = vpop.trf.xlu0 }
 0x1a5   : > { %1283 = vmatmul.mubr.msk.f32.gmra.mrb[10].mxu0 %vm482_vm2, %v471_v1 }
 0x1a6   : > { %638 = vmatprep.mubr.f32.mxu0 %v1639_v58 }
 0x1a8   : > { %v472_v2 = vpop.trf.xlu0 }
 0x1a9   : > { %1284 = vmatmul.mubr.msk.f32.gmra.mrb[12].mxu0 %vm482_vm2, %v472_v2 }
 0x1aa   : > { %644 = vmatprep.mubr.f32.mxu0 %v1639_v58 }
 0x1ac   : > { %v473_v3 = vpop.trf.xlu0 }
 0x1ad   : > { %1285 = vmatmul.mubr.msk.f32.gmra.mrb[14].mxu0 %vm482_vm2, %v473_v3 }
 0x1ae   : > { %650 = vmatprep.mubr.f32.mxu0 %v1639_v58 }
 0x1b0   : > { %v474_v4 = vpop.trf.xlu0 }
 0x1b1   : > { %1286 = vmatmul.mubr.msk.f32.gmra.mrb[16].mxu0 %vm482_vm2, %v474_v4 }
 0x1b2   : > { %656 = vmatprep.mubr.f32.mxu0 %v1639_v58 }
 0x1b4   : > { %v475_v5 = vpop.trf.xlu0 }
 0x1b5   : > { %1287 = vmatmul.mubr.msk.f32.gmra.mrb[18].mxu0 %vm482_vm2, %v475_v5 }
 0x1b6   : > { %662 = vmatprep.mubr.f32.mxu0 %v1639_v58 }
 0x1b8   : > { %v476_v6 = vpop.trf.xlu0 }
 0x1b9   : > { %1288 = vmatmul.mubr.msk.f32.gmra.mrb[20].mxu0 %vm482_vm2, %v476_v6 }
 0x1ba   : > { %668 = vmatprep.mubr.f32.mxu0 %v1639_v58 }
 0x1bc   : > { %v477_v7 = vpop.trf.xlu0 }
 0x1bd   : > { %1289 = vmatmul.mubr.msk.f32.gmra.mrb[22].mxu0 %vm482_vm2, %v477_v7 }
 0x1be   : > { %674 = vmatprep.mubr.f32.mxu0 %v1639_v58 }
 0x1c0   : > { %v478_v8 = vpop.trf.xlu0 }
 0x1c1   : > { %1290 = vmatmul.mubr.msk.f32.gmra.mrb[24].mxu0 %vm482_vm2, %v478_v8 }
 0x1c2   : > { %680 = vmatprep.mubr.f32.mxu0 %v1639_v58 }
 0x1c4   : > { %v479_v9 = vpop.trf.xlu0 }
 0x1c5   : > { %1291 = vmatmul.mubr.msk.f32.gmra.mrb[26].mxu0 %vm482_vm2, %v479_v9 }
 0x1c6   : > { %686 = vmatprep.mubr.f32.mxu0 %v1639_v58 }
 0x1c8   : > { %v480_v10 = vpop.trf.xlu0 }
 0x1c9   : > { %1292 = vmatmul.mubr.msk.f32.gmra.mrb[28].mxu0 %vm482_vm2, %v480_v10 }
 0x1ca   : > { %692 = vmatprep.mubr.f32.mxu0 %v1639_v58 }
 0x1cc   : > { %v481_v11 = vpop.trf.xlu0 }
 0x1cd   : > { %1293 = vmatmul.mubr.msk.f32.gmra.mrb[30].mxu0 %vm482_vm2, %v481_v11 }
 0x264   : > { %v1836_v12 = vpop.f32.mrb[0].mxu0 }
 0x265   : > { %v1838_v13 = vpop.f32.mrb[1].mxu0 }
 0x266   : > { %v699_v14 = vmax.f32 %v1836_v12, %v1838_v13 }
 0x268   : > { %700 = vmax.xlane.f32.xlu0 %v699_v14  ;;  %v1842_v15 = vpop.f32.mrb[2].mxu0 }
 0x269   : > { %v1844_v16 = vpop.f32.mrb[3].mxu0 }
 0x26a   : > { %v702_v17 = vmax.f32 %v1842_v15, %v1844_v16 }
 0x26c   : > { %703 = vmax.xlane.f32.xlu1 %v702_v17  ;;  %v1848_v18 = vpop.f32.mrb[4].mxu0 }
 0x26d   : > { %v1850_v19 = vpop.f32.mrb[5].mxu0 }
 0x26e   : > { %v705_v20 = vmax.f32 %v1848_v18, %v1850_v19 }
 0x270   : > { %706 = vmax.xlane.f32.xlu1 %v705_v20  ;;  %v1854_v21 = vpop.f32.mrb[6].mxu0 }
 0x271   : > { %v1856_v22 = vpop.f32.mrb[7].mxu0 }
 0x272   : > { %v708_v23 = vmax.f32 %v1854_v21, %v1856_v22 }
 0x274   : > { %709 = vmax.xlane.f32.xlu1 %v708_v23  ;;  %v1860_v24 = vpop.f32.mrb[8].mxu0 }
 0x275   : > { %v1862_v25 = vpop.f32.mrb[9].mxu0 }
 0x276   : > { %v711_v26 = vmax.f32 %v1860_v24, %v1862_v25 }
 0x278   : > { %712 = vmax.xlane.f32.xlu1 %v711_v26  ;;  %v1866_v27 = vpop.f32.mrb[10].mxu0 }
 0x279   : > { %v1868_v28 = vpop.f32.mrb[11].mxu0 }
 0x27a   : > { %v714_v29 = vmax.f32 %v1866_v27, %v1868_v28 }
 0x27c   : > { %715 = vmax.xlane.f32.xlu1 %v714_v29  ;;  %v1872_v30 = vpop.f32.mrb[12].mxu0 }
 0x27d   : > { %v1874_v31 = vpop.f32.mrb[13].mxu0 }
 0x27e   : > { %v717_v32 = vmax.f32 %v1872_v30, %v1874_v31 }
 0x280   : > { %718 = vmax.xlane.f32.xlu1 %v717_v32  ;;  %v1878_v33 = vpop.f32.mrb[14].mxu0 }
 0x281   : > { %v1880_v34 = vpop.f32.mrb[15].mxu0 }
 0x282   : > { %v720_v35 = vmax.f32 %v1878_v33, %v1880_v34 }
 0x284   : > { %721 = vmax.xlane.f32.xlu1 %v720_v35  ;;  %v1884_v36 = vpop.f32.mrb[16].mxu0 }
 0x285   : > { %v1886_v37 = vpop.f32.mrb[17].mxu0 }
 0x286   : > { %v723_v38 = vmax.f32 %v1884_v36, %v1886_v37 }
 0x288   : > { %724 = vmax.xlane.f32.xlu1 %v723_v38  ;;  %v1890_v39 = vpop.f32.mrb[18].mxu0 }
 0x289   : > { %v1892_v40 = vpop.f32.mrb[19].mxu0 }
 0x28a   : > { %v726_v41 = vmax.f32 %v1890_v39, %v1892_v40 }
 0x28c   : > { %727 = vmax.xlane.f32.xlu1 %v726_v41  ;;  %v1896_v42 = vpop.f32.mrb[20].mxu0 }
 0x28d   : > { %v1898_v43 = vpop.f32.mrb[21].mxu0 }
 0x28e   : > { %v729_v44 = vmax.f32 %v1896_v42, %v1898_v43 }
 0x290   : > { %730 = vmax.xlane.f32.xlu1 %v729_v44  ;;  %v1902_v45 = vpop.f32.mrb[22].mxu0 }
 0x291   : > { %v1904_v46 = vpop.f32.mrb[23].mxu0 }
 0x292   : > { %v732_v47 = vmax.f32 %v1902_v45, %v1904_v46 }
 0x294   : > { %733 = vmax.xlane.f32.xlu1 %v732_v47  ;;  %v1908_v48 = vpop.f32.mrb[24].mxu0 }
 0x295   : > { %v1910_v49 = vpop.f32.mrb[25].mxu0 }
 0x296   : > { %v735_v50 = vmax.f32 %v1908_v48, %v1910_v49 }
 0x298   : > { %736 = vmax.xlane.f32.xlu1 %v735_v50  ;;  %v1914_v51 = vpop.f32.mrb[26].mxu0 }
 0x299   : > { %v1916_v52 = vpop.f32.mrb[27].mxu0 }
 0x29a   : > { %v738_v53 = vmax.f32 %v1914_v51, %v1916_v52 }
 0x29c   : > { %739 = vmax.xlane.f32.xlu1 %v738_v53  ;;  %v1920_v54 = vpop.f32.mrb[28].mxu0 }
 0x29d   : > { %v1922_v55 = vpop.f32.mrb[29].mxu0 }
 0x29e   : > { %v741_v56 = vmax.f32 %v1920_v54, %v1922_v55 }
 0x2a0   : > { %742 = vmax.xlane.f32.xlu1 %v741_v56  ;;  %v1926_v57 = vpop.f32.mrb[30].mxu0 }
 0x2a1   : > { %v1928_v58 = vpop.f32.mrb[31].mxu0 }
 0x2a2   : > { %v744_v59 = vmax.f32 %v1926_v57, %v1928_v58 }
 0x2a4   : > { %745 = vmax.xlane.f32.xlu1 %v744_v59 }
 0x2f5   : > { %v701_v60 = vpop.xlane.xlu0 %700 }
 0x2f6   : > { %v747_v61 = vsub.f32 %v1836_v12, %v701_v60  ;;  %v748_v62 = vsub.f32 %v1838_v13, %v701_v60 }
 0x2f8   : > { %v779_v63 = vmul.f32 1.442695, %v747_v61  ;;  %v781_v0 = vmul.f32 1.442695, %v748_v62 }
 0x2f9   : > { %v704_v1 = vpop.xlane.xlu1 %703 }
 0x2fa   : > { %1445 = vpow2.f32 %v779_v63  ;;  %v749_v2 = vsub.f32 %v1842_v15, %v704_v1  ;;  %v750_v3 = vsub.f32 %v1844_v16, %v704_v1 }
 0x2fb   : > { %1447 = vpow2.f32 %v781_v0 }
 0x2fc   : > { %v783_v4 = vmul.f32 1.442695, %v749_v2  ;;  %v785_v5 = vmul.f32 1.442695, %v750_v3 }
 0x2fd   : > { %v707_v6 = vpop.xlane.xlu1 %706 }
 0x2fe   : > { %1449 = vpow2.f32 %v783_v4  ;;  %v751_v7 = vsub.f32 %v1848_v18, %v707_v6  ;;  %v752_v8 = vsub.f32 %v1850_v19, %v707_v6 }
 0x2ff   : > { %1451 = vpow2.f32 %v785_v5 }
 0x300   : > { %v787_v9 = vmul.f32 1.442695, %v751_v7  ;;  %v789_v10 = vmul.f32 1.442695, %v752_v8 }
 0x301   : > { %v710_v11 = vpop.xlane.xlu1 %709 }
 0x302   : > { %1453 = vpow2.f32 %v787_v9  ;;  %v753_v12 = vsub.f32 %v1854_v21, %v710_v11  ;;  %v754_v13 = vsub.f32 %v1856_v22, %v710_v11 }
 0x303   : > { %1455 = vpow2.f32 %v789_v10 }
 0x304   : > { %v1940_v14 = vpop.eup %1445  ;;  %v791_v15 = vmul.f32 1.442695, %v753_v12  ;;  %v793_v16 = vmul.f32 1.442695, %v754_v13 }
 0x305   : > { %v1942_v17 = vpop.eup %1447  ;;  %v713_v20 = vpop.xlane.xlu1 %712 }
 0x306   : > { %1457 = vpow2.f32 %v791_v15  ;;  %v755_v18 = vsub.f32 %v1860_v24, %v713_v20  ;;  %v756_v19 = vsub.f32 %v1862_v25, %v713_v20  ;;  %v843_v23 = vadd.f32 %v1942_v17, %v1940_v14 }
 0x307   : > { %1459 = vpow2.f32 %v793_v16 }
 0x308   : > { %v1948_v21 = vpop.eup %1449  ;;  %v795_v22 = vmul.f32 1.442695, %v755_v18  ;;  %v797_v26 = vmul.f32 1.442695, %v756_v19  ;;  %844 = vadd.xlane.f32.xlu1 %v843_v23 }
 0x309   : > { %v1950_v29 = vpop.eup %1451  ;;  %v716_v32 = vpop.xlane.xlu1 %715 }
 0x30a   : > { %1461 = vpow2.f32 %v795_v22  ;;  %v757_v35 = vsub.f32 %v1866_v27, %v716_v32  ;;  %v758_v38 = vsub.f32 %v1868_v28, %v716_v32  ;;  %v846_v24 = vadd.f32 %v1950_v29, %v1948_v21 }
 0x30b   : > { %1463 = vpow2.f32 %v797_v26 }
 0x30c   : > { %v1956_v25 = vpop.eup %1453  ;;  %v799_v41 = vmul.f32 1.442695, %v757_v35  ;;  %v801_v44 = vmul.f32 1.442695, %v758_v38  ;;  %847 = vadd.xlane.f32.xlu1 %v846_v24 }
 0x30d   : > { %v1958_v47 = vpop.eup %1455  ;;  %v719_v50 = vpop.xlane.xlu1 %718 }
 0x30e   : > { %1465 = vpow2.f32 %v799_v41  ;;  %v759_v53 = vsub.f32 %v1872_v30, %v719_v50  ;;  %v760_v56 = vsub.f32 %v1874_v31, %v719_v50  ;;  %v849_v27 = vadd.f32 %v1958_v47, %v1956_v25 }
 0x30f   : > { %1467 = vpow2.f32 %v801_v44 }
 0x310   : > { %v1964_v28 = vpop.eup %1457  ;;  %v803_v59 = vmul.f32 1.442695, %v759_v53  ;;  %v805_v60 = vmul.f32 1.442695, %v760_v56  ;;  %850 = vadd.xlane.f32.xlu1 %v849_v27 }
 0x311   : > { %v1966_v61 = vpop.eup %1459  ;;  %v722_v62 = vpop.xlane.xlu1 %721 }
 0x312   : > { %1469 = vpow2.f32 %v803_v59  ;;  %v761_v63 = vsub.f32 %v1878_v33, %v722_v62  ;;  %v762_v0 = vsub.f32 %v1880_v34, %v722_v62  ;;  %v852_v30 = vadd.f32 %v1966_v61, %v1964_v28 }
 0x313   : > { %1471 = vpow2.f32 %v805_v60 }
 0x314   : > { %v1972_v31 = vpop.eup %1461  ;;  %v807_v1 = vmul.f32 1.442695, %v761_v63  ;;  %v809_v2 = vmul.f32 1.442695, %v762_v0  ;;  %853 = vadd.xlane.f32.xlu1 %v852_v30 }
 0x315   : > { %v1974_v3 = vpop.eup %1463  ;;  %v725_v4 = vpop.xlane.xlu1 %724 }
 0x316   : > { %1473 = vpow2.f32 %v807_v1  ;;  %v763_v5 = vsub.f32 %v1884_v36, %v725_v4  ;;  %v764_v6 = vsub.f32 %v1886_v37, %v725_v4  ;;  %v855_v33 = vadd.f32 %v1974_v3, %v1972_v31 }
 0x317   : > { %1475 = vpow2.f32 %v809_v2 }
 0x318   : > { %v1980_v34 = vpop.eup %1465  ;;  %v811_v7 = vmul.f32 1.442695, %v763_v5  ;;  %v813_v8 = vmul.f32 1.442695, %v764_v6  ;;  %856 = vadd.xlane.f32.xlu1 %v855_v33 }
 0x319   : > { %v1982_v9 = vpop.eup %1467  ;;  %v728_v10 = vpop.xlane.xlu1 %727 }
 0x31a   : > { %1477 = vpow2.f32 %v811_v7  ;;  %v765_v11 = vsub.f32 %v1890_v39, %v728_v10  ;;  %v766_v12 = vsub.f32 %v1892_v40, %v728_v10  ;;  %v858_v36 = vadd.f32 %v1982_v9, %v1980_v34 }
 0x31b   : > { %1479 = vpow2.f32 %v813_v8 }
 0x31c   : > { %v1988_v37 = vpop.eup %1469  ;;  %v815_v13 = vmul.f32 1.442695, %v765_v11  ;;  %v817_v15 = vmul.f32 1.442695, %v766_v12  ;;  %859 = vadd.xlane.f32.xlu1 %v858_v36 }
 0x31d   : > { %v1990_v16 = vpop.eup %1471  ;;  %v731_v20 = vpop.xlane.xlu1 %730 }
 0x31e   : > { %1481 = vpow2.f32 %v815_v13  ;;  %v767_v18 = vsub.f32 %v1896_v42, %v731_v20  ;;  %v768_v19 = vsub.f32 %v1898_v43, %v731_v20  ;;  %v861_v39 = vadd.f32 %v1990_v16, %v1988_v37 }
 0x31f   : > { %1483 = vpow2.f32 %v817_v15 }
 0x320   : > { %v1996_v40 = vpop.eup %1473  ;;  %v819_v23 = vmul.f32 1.442695, %v767_v18  ;;  %v821_v22 = vmul.f32 1.442695, %v768_v19  ;;  %862 = vadd.xlane.f32.xlu1 %v861_v39 }
 0x321   : > { %v1998_v26 = vpop.eup %1475  ;;  %v734_v32 = vpop.xlane.xlu1 %733 }
 0x322   : > { %1485 = vpow2.f32 %v819_v23  ;;  %v769_v35 = vsub.f32 %v1902_v45, %v734_v32  ;;  %v770_v38 = vsub.f32 %v1904_v46, %v734_v32  ;;  %v864_v42 = vadd.f32 %v1998_v26, %v1996_v40 }
 0x323   : > { %1487 = vpow2.f32 %v821_v22 }
 0x324   : > { %v2004_v43 = vpop.eup %1477  ;;  %v823_v24 = vmul.f32 1.442695, %v769_v35  ;;  %v825_v41 = vmul.f32 1.442695, %v770_v38  ;;  %865 = vadd.xlane.f32.xlu1 %v864_v42  ;;  %v445_v38 = vld [vmem:[#allocation2 + $0x38] sm:$0xff]  ;;  %v443_v42 = vld [vmem:[#allocation2 + $0x28] sm:$0xff] }
 0x325   : > { %v2006_v44 = vpop.eup %1479  ;;  %v737_v50 = vpop.xlane.xlu1 %736  ;;  %1040 = vmatprep.mubr.f32.mxu1 %v445_v38  ;;  %1035 = vmatprep.mubr.f32.mxu0 %v443_v42 }
 0x326   : > { %1489 = vpow2.f32 %v823_v24  ;;  %v771_v53 = vsub.f32 %v1908_v48, %v737_v50  ;;  %v772_v56 = vsub.f32 %v1910_v49, %v737_v50  ;;  %v867_v45 = vadd.f32 %v2006_v44, %v2004_v43 }
 0x327   : > { %1491 = vpow2.f32 %v825_v41 }
 0x328   : > { %v2012_v46 = vpop.eup %1481  ;;  %v827_v27 = vmul.f32 1.442695, %v771_v53  ;;  %v829_v59 = vmul.f32 1.442695, %v772_v56  ;;  %868 = vadd.xlane.f32.xlu1 %v867_v45 }
 0x329   : > { %v2014_v60 = vpop.eup %1483  ;;  %v740_v62 = vpop.xlane.xlu1 %739 }
 0x32a   : > { %1493 = vpow2.f32 %v827_v27  ;;  %v773_v63 = vsub.f32 %v1914_v51, %v740_v62  ;;  %v774_v0 = vsub.f32 %v1916_v52, %v740_v62  ;;  %v870_v48 = vadd.f32 %v2014_v60, %v2012_v46 }
 0x32b   : > { %1495 = vpow2.f32 %v829_v59 }
 0x32c   : > { %v2020_v49 = vpop.eup %1485  ;;  %v831_v30 = vmul.f32 1.442695, %v773_v63  ;;  %v833_v1 = vmul.f32 1.442695, %v774_v0  ;;  %871 = vadd.xlane.f32.xlu1 %v870_v48 }
 0x32d   : > { %v2022_v2 = vpop.eup %1487  ;;  %v743_v4 = vpop.xlane.xlu1 %742 }
 0x32e   : > { %1497 = vpow2.f32 %v831_v30  ;;  %v775_v5 = vsub.f32 %v1920_v54, %v743_v4  ;;  %v776_v6 = vsub.f32 %v1922_v55, %v743_v4  ;;  %v873_v51 = vadd.f32 %v2022_v2, %v2020_v49 }
 0x32f   : > { %1499 = vpow2.f32 %v833_v1 }
 0x330   : > { %v2028_v52 = vpop.eup %1489  ;;  %v835_v33 = vmul.f32 1.442695, %v775_v5  ;;  %v837_v7 = vmul.f32 1.442695, %v776_v6  ;;  %874 = vadd.xlane.f32.xlu1 %v873_v51 }
 0x331   : > { %v2030_v8 = vpop.eup %1491  ;;  %v746_v10 = vpop.xlane.xlu1 %745 }
 0x332   : > { %1501 = vpow2.f32 %v835_v33  ;;  %v777_v11 = vsub.f32 %v1926_v57, %v746_v10  ;;  %v778_v12 = vsub.f32 %v1928_v58, %v746_v10  ;;  %v876_v54 = vadd.f32 %v2030_v8, %v2028_v52 }
 0x333   : > { %1503 = vpow2.f32 %v837_v7 }
 0x334   : > { %v2036_v55 = vpop.eup %1493  ;;  %v839_v36 = vmul.f32 1.442695, %v777_v11  ;;  %v841_v13 = vmul.f32 1.442695, %v778_v12  ;;  %877 = vadd.xlane.f32.xlu1 %v876_v54 }
 0x335   : > { %v2038_v15 = vpop.eup %1495 }
 0x336   : > { %1505 = vpow2.f32 %v839_v36  ;;  %v879_v20 = vadd.f32 %v2038_v15, %v2036_v55 }
 0x337   : > { %1507 = vpow2.f32 %v841_v13 }
 0x338   : > { %v2042_v18 = vpop.eup %1497  ;;  %880 = vadd.xlane.f32.xlu1 %v879_v20 }
 0x339   : > { %v2044_v57 = vpop.eup %1499 }
 0x33a   : > { %v882_v58 = vadd.f32 %v2044_v57, %v2042_v18 }
 0x33c   : > { %v2048_v19 = vpop.eup %1501  ;;  %883 = vadd.xlane.f32.xlu0 %v882_v58 }
 0x33d   : > { %v2050_v39 = vpop.eup %1503 }
 0x33e   : > { %v885_v23 = vadd.f32 %v2050_v39, %v2048_v19 }
 0x340   : > { %v2054_v22 = vpop.eup %1505  ;;  %886 = vadd.xlane.f32.xlu1 %v885_v23 }
 0x341   : > { %v2056_v32 = vpop.eup %1507 }
 0x342   : > { %v888_v35 = vadd.f32 %v2056_v32, %v2054_v22 }
 0x344   : > { %889 = vadd.xlane.f32.xlu0 %v888_v35 }
 0x395   : > { %v845_v24 = vpop.xlane.xlu1 %844 }
 0x396   : > { %1509 = vrcp.f32 %v845_v24 }
 0x399   : > { %v848_v41 = vpop.xlane.xlu1 %847 }
 0x39a   : > { %1511 = vrcp.f32 %v848_v41 }
 0x39d   : > { %v851_v50 = vpop.xlane.xlu1 %850 }
 0x39e   : > { %1513 = vrcp.f32 %v851_v50 }
 0x3a0   : > { %v1510_v53 = vpop.eup %1509 }
 0x3a1   : > { %v854_v56 = vpop.xlane.xlu1 %853  ;;  %v893_v45 = vmul.f32 %v1510_v53, %v1942_v17  ;;  %v892_v27 = vmul.f32 %v1510_v53, %v1940_v14 }
 0x3a2   : > { %1515 = vrcp.f32 %v854_v56 }
 0x3a3   : > { %940 = vst [vmem:[%s1761_s6 + $0x8] sm:$0xff] %v893_v45  ;;  %939 = vst [vmem:[%s1761_s6] sm:$0xff] %v892_v27 }
 0x3a4   : > { %v1512_v59 = vpop.eup %1511 }
 0x3a5   : > { %v857_v62 = vpop.xlane.xlu1 %856  ;;  %v896_v63 = vmul.f32 %v1512_v59, %v1950_v29  ;;  %v895_v0 = vmul.f32 %v1512_v59, %v1948_v21 }
 0x3a6   : > { %1517 = vrcp.f32 %v857_v62 }
 0x3a7   : > { %942 = vst [vmem:[%s1761_s6 + $0x18] sm:$0xff] %v896_v63  ;;  %v1315_v48 = vpack.c.bf16 %v896_v63, %v893_v45  ;;  %941 = vst [vmem:[%s1761_s6 + $0x10] sm:$0xff] %v895_v0  ;;  %v1317_v30 = vpack.c.bf16 %v895_v0, %v892_v27 }
 0x3a8   : > { %v1514_v1 = vpop.eup %1513 }
 0x3a9   : > { %1316 = vmatprep.subr.bf16.mxu0 %v1315_v48  ;;  %1351 = vmatprep.subr.bf16.mxu1 %v1315_v48  ;;  %v860_v14 = vpop.xlane.xlu1 %859  ;;  %v899_v17 = vmul.f32 %v1514_v1, %v1958_v47  ;;  %v898_v4 = vmul.f32 %v1514_v1, %v1956_v25 }
 0x3aa   : > { %1519 = vrcp.f32 %v860_v14  ;;  %1318 = vmatpush1.bf16.xpose.msra.mxu0 %v1317_v30  ;;  %1359 = vmatpush1.bf16.xpose.msra.mxu1 %v1317_v30 }
 0x3ab   : > { %944 = vst [vmem:[%s1761_s6 + $0x28] sm:$0xff] %v899_v17  ;;  %943 = vst [vmem:[%s1761_s6 + $0x20] sm:$0xff] %v898_v4 }
 0x3ac   : > { %v1516_v21 = vpop.eup %1515 }
 0x3ad   : > { %v863_v29 = vpop.xlane.xlu1 %862  ;;  %v902_v5 = vmul.f32 %v1516_v21, %v1966_v61  ;;  %v901_v6 = vmul.f32 %v1516_v21, %v1964_v28 }
 0x3ae   : > { %1521 = vrcp.f32 %v863_v29 }
 0x3af   : > { %946 = vst [vmem:[%s1761_s6 + $0x38] sm:$0xff] %v902_v5  ;;  %v1319_v51 = vpack.c.bf16 %v902_v5, %v899_v17  ;;  %945 = vst [vmem:[%s1761_s6 + $0x30] sm:$0xff] %v901_v6  ;;  %v1321_v47 = vpack.c.bf16 %v901_v6, %v898_v4  ;;  %v447_v6 = vld [vmem:[#allocation2 + $0x48] sm:$0xff] }
 0x3b0   : > { %v1518_v33 = vpop.eup %1517 }
 0x3b1   : > { %1320 = vmatprep.subr.bf16.mxu0 %v1319_v51  ;;  %1352 = vmatprep.subr.bf16.mxu1 %v1319_v51  ;;  %v866_v25 = vpop.xlane.xlu1 %865  ;;  %v905_v7 = vmul.f32 %v1518_v33, %v1974_v3  ;;  %v904_v10 = vmul.f32 %v1518_v33, %v1972_v31  ;;  %v446_v51 = vld [vmem:[#allocation2 + $0x40] sm:$0xff] }
 0x3b2   : > { %1523 = vrcp.f32 %v866_v25  ;;  %1322 = vmatpush1.bf16.xpose.msra.mxu0 %v1321_v47  ;;  %1360 = vmatpush1.bf16.xpose.msra.mxu1 %v1321_v47  ;;  %v1063_v47 = vstv %s1062_s10  ;;  %v1059_v25 = vld [vmem:[%s1057_s11 + $0x10] sm:$0xff] }
 0x3b3   : > { %948 = vst [vmem:[%s1761_s6 + $0x48] sm:$0xff] %v905_v7  ;;  %947 = vst [vmem:[%s1761_s6 + $0x40] sm:$0xff] %v904_v10 }
 0x3b4   : > { %v1520_v28 = vpop.eup %1519 }
 0x3b5   : > { %v869_v61 = vpop.xlane.xlu1 %868  ;;  %v908_v11 = vmul.f32 %v1520_v28, %v1982_v9  ;;  %v907_v12 = vmul.f32 %v1520_v28, %v1980_v34 }
 0x3b6   : > { %1525 = vrcp.f32 %v869_v61 }
 0x3b7   : > { %950 = vst [vmem:[%s1761_s6 + $0x58] sm:$0xff] %v908_v11  ;;  %v1323_v54 = vpack.c.bf16 %v908_v11, %v905_v7  ;;  %949 = vst [vmem:[%s1761_s6 + $0x50] sm:$0xff] %v907_v12  ;;  %v1325_v3 = vpack.c.bf16 %v907_v12, %v904_v10  ;;  %v1058_v10 = vld [vmem:[%s1057_s11] sm:$0xff] }
 0x3b8   : > { %v1522_v36 = vpop.eup %1521 }
 0x3b9   : > { %1324 = vmatprep.subr.bf16.mxu0 %v1323_v54  ;;  %1353 = vmatprep.subr.bf16.mxu1 %v1323_v54  ;;  %v872_v31 = vpop.xlane.xlu1 %871  ;;  %v911_v13 = vmul.f32 %v1522_v36, %v1990_v16  ;;  %v910_v20 = vmul.f32 %v1522_v36, %v1988_v37 }
 0x3ba   : > { %1527 = vrcp.f32 %v872_v31  ;;  %1326 = vmatpush1.bf16.xpose.msra.mxu0 %v1325_v3  ;;  %1361 = vmatpush1.bf16.xpose.msra.mxu1 %v1325_v3  ;;  %v1060_v31 = vld [vmem:[%s1057_s11 + $0x20] sm:$0xff] }
 0x3bb   : > { %952 = vst [vmem:[%s1761_s6 + $0x68] sm:$0xff] %v911_v13  ;;  %951 = vst [vmem:[%s1761_s6 + $0x60] sm:$0xff] %v910_v20 }
 0x3bc   : > { %v1524_v34 = vpop.eup %1523 }
 0x3bd   : > { %v875_v9 = vpop.xlane.xlu1 %874  ;;  %v914_v58 = vmul.f32 %v1524_v34, %v1998_v26  ;;  %v913_v23 = vmul.f32 %v1524_v34, %v1996_v40 }
 0x3be   : > { %1529 = vrcp.f32 %v875_v9 }
 0x3bf   : > { %954 = vst [vmem:[%s1761_s6 + $0x78] sm:$0xff] %v914_v58  ;;  %v1327_v35 = vpack.c.bf16 %v914_v58, %v911_v13  ;;  %953 = vst [vmem:[%s1761_s6 + $0x70] sm:$0xff] %v913_v23  ;;  %v1329_v16 = vpack.c.bf16 %v913_v23, %v910_v20  ;;  %v1061_v58 = vld [vmem:[%s1057_s11 + $0x30] sm:$0xff] }
 0x3c0   : > { %v1526_v38 = vpop.eup %1525 }
 0x3c1   : > { %1328 = vmatprep.subr.bf16.mxu0 %v1327_v35  ;;  %1354 = vmatprep.subr.bf16.mxu1 %v1327_v35  ;;  %v878_v37 = vpop.xlane.xlu1 %877  ;;  %v917_v42 = vmul.f32 %v1526_v38, %v2006_v44  ;;  %v916_v24 = vmul.f32 %v1526_v38, %v2004_v43 }
 0x3c2   : > { %1531 = vrcp.f32 %v878_v37  ;;  %1330 = vmatpush1.bf16.xpose.msra.mxu0 %v1329_v16  ;;  %1362 = vmatpush1.bf16.xpose.msra.mxu1 %v1329_v16 }
 0x3c3   : > { %956 = vst [vmem:[%s1761_s6 + $0x88] sm:$0xff] %v917_v42  ;;  %955 = vst [vmem:[%s1761_s6 + $0x80] sm:$0xff] %v916_v24 }
 0x3c4   : > { %v1528_v40 = vpop.eup %1527 }
 0x3c5   : > { %v881_v26 = vpop.xlane.xlu1 %880  ;;  %v920_v41 = vmul.f32 %v1528_v40, %v2014_v60  ;;  %v919_v50 = vmul.f32 %v1528_v40, %v2012_v46 }
 0x3c6   : > { %1533 = vrcp.f32 %v881_v26 }
 0x3c7   : > { %958 = vst [vmem:[%s1761_s6 + $0x98] sm:$0xff] %v920_v41  ;;  %v1331_v53 = vpack.c.bf16 %v920_v41, %v917_v42  ;;  %957 = vst [vmem:[%s1761_s6 + $0x90] sm:$0xff] %v919_v50  ;;  %v1333_v44 = vpack.c.bf16 %v919_v50, %v916_v24 }
 0x3c8   : > { %v1530_v56 = vpop.eup %1529 }
 0x3c9   : > { %1332 = vmatprep.subr.bf16.mxu0 %v1331_v53  ;;  %1355 = vmatprep.subr.bf16.mxu1 %v1331_v53  ;;  %v884_v43 = vpop.xlane.xlu0 %883  ;;  %v923_v45 = vmul.f32 %v1530_v56, %v2022_v2  ;;  %v922_v27 = vmul.f32 %v1530_v56, %v2020_v49 }
 0x3ca   : > { %1535 = vrcp.f32 %v884_v43  ;;  %1334 = vmatpush1.bf16.xpose.msra.mxu0 %v1333_v44  ;;  %1363 = vmatpush1.bf16.xpose.msra.mxu1 %v1333_v44 }
 0x3cb   : > { %960 = vst [vmem:[%s1761_s6 + $0xa8] sm:$0xff] %v923_v45  ;;  %959 = vst [vmem:[%s1761_s6 + $0xa0] sm:$0xff] %v922_v27 }
 0x3cc   : > { %v1532_v46 = vpop.eup %1531 }
 0x3cd   : > { %v887_v60 = vpop.xlane.xlu1 %886  ;;  %v926_v59 = vmul.f32 %v1532_v46, %v2030_v8  ;;  %v925_v62 = vmul.f32 %v1532_v46, %v2028_v52 }
 0x3ce   : > { %1537 = vrcp.f32 %v887_v60 }
 0x3cf   : > { %962 = vst [vmem:[%s1761_s6 + $0xb8] sm:$0xff] %v926_v59  ;;  %v1335_v63 = vpack.c.bf16 %v926_v59, %v923_v45  ;;  %961 = vst [vmem:[%s1761_s6 + $0xb0] sm:$0xff] %v925_v62  ;;  %v1337_v2 = vpack.c.bf16 %v925_v62, %v922_v27 }
 0x3d0   : > { %v1534_v49 = vpop.eup %1533 }
 0x3d1   : > { %1336 = vmatprep.subr.bf16.mxu0 %v1335_v63  ;;  %1356 = vmatprep.subr.bf16.mxu1 %v1335_v63  ;;  %v890_v0 = vpop.xlane.xlu0 %889  ;;  %v929_v48 = vmul.f32 %v1534_v49, %v2038_v15  ;;  %v928_v30 = vmul.f32 %v1534_v49, %v2036_v55 }
 0x3d2   : > { %1539 = vrcp.f32 %v890_v0  ;;  %1338 = vmatpush1.bf16.xpose.msra.mxu0 %v1337_v2  ;;  %1364 = vmatpush1.bf16.xpose.msra.mxu1 %v1337_v2 }
 0x3d3   : > { %964 = vst [vmem:[%s1761_s6 + $0xc8] sm:$0xff] %v929_v48  ;;  %963 = vst [vmem:[%s1761_s6 + $0xc0] sm:$0xff] %v928_v30 }
 0x3d4   : > { %v1536_v52 = vpop.eup %1535 }
 0x3d5   : > { %v932_v8 = vmul.f32 %v1536_v52, %v2044_v57  ;;  %v931_v1 = vmul.f32 %v1536_v52, %v2042_v18 }
 0x3d7   : > { %966 = vst [vmem:[%s1761_s6 + $0xd8] sm:$0xff] %v932_v8  ;;  %v1339_v14 = vpack.c.bf16 %v932_v8, %v929_v48  ;;  %965 = vst [vmem:[%s1761_s6 + $0xd0] sm:$0xff] %v931_v1  ;;  %v1341_v15 = vpack.c.bf16 %v931_v1, %v928_v30 }
 0x3d8   : > { %v1538_v17 = vpop.eup %1537 }
 0x3d9   : > { %1340 = vmatprep.subr.bf16.mxu0 %v1339_v14  ;;  %1357 = vmatprep.subr.bf16.mxu1 %v1339_v14  ;;  %v935_v55 = vmul.f32 %v1538_v17, %v2050_v39  ;;  %v934_v4 = vmul.f32 %v1538_v17, %v2048_v19  ;;  %v444_v19 = vld [vmem:[#allocation2 + $0x30] sm:$0xff]  ;;  %v442_v39 = vld [vmem:[#allocation2 + $0x20] sm:$0xff] }
 0x3da   : > { %1342 = vmatpush1.bf16.xpose.msra.mxu0 %v1341_v15  ;;  %1365 = vmatpush1.bf16.xpose.msra.mxu1 %v1341_v15 }
 0x3db   : > { %968 = vst [vmem:[%s1761_s6 + $0xe8] sm:$0xff] %v935_v55  ;;  %967 = vst [vmem:[%s1761_s6 + $0xe0] sm:$0xff] %v934_v4 }
 0x3dc   : > { %v1540_v57 = vpop.eup %1539 }
 0x3dd   : > { %v938_v18 = vmul.f32 %v1540_v57, %v2056_v32  ;;  %v937_v21 = vmul.f32 %v1540_v57, %v2054_v22  ;;  %v449_v32 = vld [vmem:[#allocation2 + $0x58] sm:$0xff]  ;;  %v448_v22 = vld [vmem:[#allocation2 + $0x50] sm:$0xff] }
 0x3df   : > { %970 = vst [vmem:[%s1761_s6 + $0xf8] sm:$0xff] %v938_v18  ;;  %v1343_v29 = vpack.c.bf16 %v938_v18, %v935_v55  ;;  %969 = vst [vmem:[%s1761_s6 + $0xf0] sm:$0xff] %v937_v21  ;;  %v1345_v5 = vpack.c.bf16 %v937_v21, %v934_v4 }
 0x3e1   : > { %1344 = vmatprep.subr.bf16.mxu0 %v1343_v29  ;;  %1358 = vmatprep.subr.bf16.mxu1 %v1343_v29 }
 0x3e2   : > { %1346 = vmatpush1.bf16.xpose.msra.mxu0 %v1345_v5  ;;  %1366 = vmatpush1.bf16.xpose.msra.mxu1 %v1345_v5 }
 0x3e9   : > { %1041 = vmatmul.mubr.f32.vlgmr.msra.gmra.mrb[0].mxu1 %v444_v19  ;;  %1036 = vmatmul.mubr.f32.vlgmr.msra.gmra.mrb[32].mxu0 %v442_v39 }
 0x3ea   : > { %1045 = vmatprep.mubr.f32.mxu1 %v447_v6 }
 0x3ed   : > { %1046 = vmatmul.mubr.f32.gmra.mrb[2].mxu1 %v446_v51 }
 0x3ee   : > { %1050 = vmatprep.mubr.f32.mxu1 %v449_v32 }
 0x3f1   : > { %1051 = vmatmul.mubr.f32.gmra.mrb[4].mxu1 %v448_v22 }
 0x4bc   : > { %v1042_v33 = vpop.f32.mrb[0].mxu1  ;;  %v1037_v7 = vpop.f32.mrb[32].mxu0 }
 0x4bd   : > { %v1065_v28 = vmul.f32 %v1063_v47, %v1042_v33  ;;  %v1044_v61 = vpop.f32.mrb[1].mxu1  ;;  %v1064_v11 = vmul.f32 %v1063_v47, %v1037_v7  ;;  %v1039_v12 = vpop.f32.mrb[33].mxu0 }
 0x4bf   : > { %v1069_v54 = vadd.f32 %v1065_v28, %v1059_v25  ;;  %v1068_v3 = vadd.f32 %v1064_v11, %v1058_v10 }
 0x4c0   : > { %v1047_v36 = vpop.f32.mrb[2].mxu1 }
 0x4c1   : > { %1073 = vst [vmem:[%s1759_s28 + $0x8] sm:$0xff] %v1069_v54  ;;  %v1066_v13 = vmul.f32 %v1063_v47, %v1047_v36  ;;  %v1049_v20 = vpop.f32.mrb[3].mxu1  ;;  %1072 = vst [vmem:[%s1759_s28] sm:$0xff] %v1068_v3 }
 0x4c3   : > { %v1070_v34 = vadd.f32 %v1066_v13, %v1060_v31  ;;  %1087 = sbr.rel (!%p1727_p3) target bundleno = 1234 (0x4d2), region = 44 }
 0x4c4   : > { %v1052_v9 = vpop.f32.mrb[4].mxu1 }
 0x4c5   : > { %1074 = vst [vmem:[%s1759_s28 + $0x10] sm:$0xff] %v1070_v34  ;;  %v1067_v23 = vmul.f32 %v1063_v47, %v1052_v9  ;;  %v1054_v35 = vpop.f32.mrb[5].mxu1 }
 0x4c7   : > { %v1071_v16 = vadd.f32 %v1067_v23, %v1061_v58 }
 0x4c8   : > { %v1125_v38 = vld [vmem:[%s1759_s28] sm:$0xff] (%p1727_p3)  ;;  %v1127_v37 = vld [vmem:[%s1759_s28 + $0x8] sm:$0xff] (%p1727_p3) }
 0x4c9   : > { %1075 = vst [vmem:[%s1759_s28 + $0x18] sm:$0xff] %v1071_v16  ;;  %1126 = vst [vmem:[%s1091_s19] sm:$0xff] (%p1727_p3), %v1125_v38 }
 0x4ca   : > { %1128 = vst [vmem:[%s1091_s19 + $0x10] sm:$0xff] %v1127_v37 }
 0x4cc   : > { %v1129_v42 = vld [vmem:[%s1759_s28 + $0x10] sm:$0xff] }
 0x4cd   : > { %1130 = vst [vmem:[%s1091_s19 + $0x20] sm:$0xff] %v1129_v42 }
 0x4d0   : > { %v1131_v24 = vld [vmem:[%s1759_s28 + $0x18] sm:$0xff] }
 0x4d1   : > { %1132 = vst [vmem:[%s1091_s19 + $0x30] sm:$0xff] %v1131_v24 }
 0x4d2 PF: > { %s1306_s9 = sshll.u32 %s1619_s23, 5  ;;  %s1301_s10 = sshll.u32 %s1623_s24, 6 }
 0x4d3   : > { %s1145_s11 = sadd.s32 %s1306_s9, %s1301_s10  ;;  %s1148_s14 = sshll.u32 %s1761_s6, 4  ;;  %s2146_s14 = int_to_ptr.vmem [resolvable:$true] %s1148_s14 }
 0x4d4   : > { %s1302_s0 = sshll.u32 %s1145_s11, 7  ;;  %s1541_s17 = scalar_lea.vmem %s2146_s14, 4096 }
 0x4d5   : > { %s2151_s16 = scalar_lea.hbm %s2209_s5, %s1302_s0  ;;  %p1542_p0 = scmp.ne.s32.totalorder %s2146_s14, %s1541_s17 }
 0x4d6   : > { %s1640_s23 = smov [#allocation5]  }
 0x4d7   : > { %p1543_p1 = pnand %p1542_p0, %p1727_p3  ;;  %s1545_s24 = sshll.u32 %s1640_s23, 4  ;;  %s1546_s24 = int_to_ptr.vmem [resolvable:$false] %s1545_s24 }
 0x4d8   : > { %s1547_s6 = scalar_lea.vmem %s1546_s24, 8192  ;;  %p1548_p4 = scmp.lt.s32.totalorder %s2146_s14, %s1546_s24 }
 0x4d9   : > { %p1544_p2 = pneg %p1543_p1  ;;  %p1549_p5 = scmp.lt.s32.totalorder %s1547_s6, %s1541_s17 }
 0x4db   : > { %p1550_p6 = por %p1549_p5, %p1548_p4 }
 0x4dd   : > { %p1551_p7 = pnand %p1550_p6, %p1544_p2 }
 0x4df   : > { %1554 = shalt.err (!%p1551_p7)
}
 0x4e0   : > { %s1555_s0 = scalar_lea.hbm %s2151_s16, 4096  ;;  %s1559_s9 = scalar_lea.hbm %s2209_s5, 16384 }
 0x4e1   : > { %p1556_p9 = scmp.ne.s32.totalorder %s2151_s16, %s1555_s0  ;;  %p1560_p12 = scmp.lt.u32.totalorder %s2151_s16, %s2209_s5 }
 0x4e2   : > { %p1561_p13 = scmp.lt.u32.totalorder %s1559_s9, %s1555_s0  ;;  %p1563_p1 = scmp.lt.u32.totalorder %s1555_s0, %s2151_s16 }
 0x4e3   : > { %p1557_p10 = pnand %p1556_p9, %p1727_p3 }
 0x4e4   : > { %p1562_p0 = por %p1561_p13, %p1560_p12 }
 0x4e5   : > { %p1558_p11 = pneg %p1557_p10 }
 0x4e6   : > { %p1564_p2 = por %p1563_p1, %p1562_p0 }
 0x4e8   : > { %p1565_p4 = pnand %p1564_p2, %p1558_p11 }
 0x4ea   : > { %1568 = shalt.err (!%p1565_p4)
}
 0x4eb   : > { %s1641_s28 = smov 256   ;;  %s1642_s15 = smov 16  }
 0x4ec   : > { %s2212_s17 = scalar_lea.sflag [#allocation6], %s1748_s13 }
 0x4ed   : > { %1367 = dma.vmem_to_hbm [thread:$0]  (%p1727_p3), %s2146_s14, 4096, %s2151_s16, %s2212_s17, %s1641_s28, %s1641_s28, %s1642_s15  }
 0x4ee PF: > { %p1373_p5 = scmp.ge.s32.totalorder %s1635_s27, 2  ;;  %s1170_s23 = sand.u32 1, %s1607_s20  }
 0x4ef   : > { %s1171_s24 = scalar_lea.sflag [#allocation6], %s1170_s23 }
 0x4f0   : > { %p1370_p6 = pnand %p1373_p5, %p1736_p8 }
 0x4f2   : > { %1602 = dma.done.wait (!%p1370_p6), %s1171_s24, 4096  }
 0x4f3   : > { %1604 = vsyncadd (!%p1370_p6), %s1171_s24, 4294963200  ;;  %s20_s27 = sadd.s32 1, %s1635_s27   ;;  %s2213_s20 = smov %s1611_s21 }
 0x4f4   : > { %p17_p7 = scmp.ge.s32.totalorder %s20_s27, 6   ;;  %s2214_s21 = smov %s1615_s22 }
 0x4f5   : > { %s2215_s22 = smov %s1745_s12  ;;  %s2216_s23 = smov %s1627_s25 }
 0x4f6   : > { %s2217_s24 = smov %s1631_s26  ;;  %s2218_s25 = smov %s2221_s29 }
 0x4f7   : > { %s2219_s26 = smov %s2225_s30  ;;  %19 = sbr.rel (!%p17_p7) target bundleno = 7 (0x7), region = 127 }
 0x4fe   :  { %1176 = vsyncpa [#allocation6], 1 }
 0x4ff   :  { %1178 = vsyncpa [#allocation6 + $0x1], 1 }

</bundles_post_ra>
